<compile_context>
chip_gen: v5e
topology: v5e:2x2
jax: 0.10.0
libtpu: 0.0.40
codegen_flags: <defaults>
</compile_context>

<pallas_src>
import functools
import math

import numpy as np
import jax
import jax.numpy as jnp
from jax.experimental import pallas as pl
from jax.experimental.pallas import tpu as pltpu


LANE = 128
_OUT_TILE_BUDGET = 2 * 1024 * 1024   # bytes per output tile buffer


def _round_up(a, b):
    return (a + b - 1) // b * b


def _pe2d_rgb_kernel(pos_ref, o_ref, *, half, channels):
    # pos_ref: (2, NT)        row 0 = x positions, row 1 = y positions
    # o_ref:   (4*half, NT)   rows: [sin_x | cos_x | sin_y | cos_y]
    nt = pos_ref.shape[-1]
    pos = pos_ref[...].astype(jnp.float32)          # force f32 compute
    pos_x = pos[0:1, :]                             # (1, NT)
    pos_y = pos[1:2, :]                             # (1, NT)

    # inv_freq[j] = 10000 ** (-2j / channels) = exp(-(2 ln 1e4 / channels) * j)
    j = jax.lax.broadcasted_iota(jnp.int32, (half, nt), 0).astype(jnp.float32)
    inv = jnp.exp(j * (-2.0 * math.log(10000.0) / channels))   # (half, NT)

    ax = inv * pos_x                                # sublane broadcast
    ay = inv * pos_y
    emb = jnp.concatenate(
        [jnp.sin(ax), jnp.cos(ax), jnp.sin(ay), jnp.cos(ay)], axis=0
    )                                               # (4*half, NT), sublane concat
    o_ref[...] = emb.astype(o_ref.dtype)


def positional_encoding_2d_rgb(tensor, channels, *, row_tile=None):
    """tensor: (B, P, D) with D >= 2 ; returns (B, P, 2*channels)."""
    B, P, D = tensor.shape
    half = channels // 2
    out_c = 2 * channels                            # == 4 * half
    N = B * P

    itemsize = jnp.dtype(tensor.dtype).itemsize
    if row_tile is None:
        # Largest lane tile whose output buffer stays within the budget
        # (double-buffered by the BlockSpec pipeline; plenty of headroom
        # even on v7x's 64 MiB VMEM).
        row_tile = max(LANE,
                       (_OUT_TILE_BUDGET // max(1, out_c * itemsize))
                       // LANE * LANE)

    nt = max(LANE, min(_round_up(row_tile, LANE), _round_up(N, LANE)))
    n_pad = _round_up(N, nt)
    grid = (n_pad // nt,)

    # Only the two used columns, lane-major: (2, N) padded to (2, n_pad).
    xy = tensor[..., :2].reshape(N, 2).T
    if n_pad != N:
        xy = jnp.pad(xy, ((0, 0), (0, n_pad - N)))

    cost = pl.CostEstimate(
        flops=3 * half * n_pad,
        transcendentals=5 * half * n_pad,
        bytes_accessed=(2 + out_c) * n_pad * itemsize,
    )

    kernel = functools.partial(_pe2d_rgb_kernel, half=half, channels=channels)

    out_t = pl.pallas_call(
        kernel,
        out_shape=jax.ShapeDtypeStruct((out_c, n_pad), tensor.dtype),
        grid=grid,
        in_specs=[pl.BlockSpec((2, nt), lambda i: (0, i))],
        out_specs=pl.BlockSpec((out_c, nt), lambda i: (0, i)),
        compiler_params=pltpu.CompilerParams(
            dimension_semantics=("parallel",)),
        cost_estimate=cost,
    )(xy)

    # (out_c, n_pad) -> (B, P, out_c): cheap layout plumbing outside the kernel.
    return out_t[:, :N].T.reshape(B, P, out_c)


class PositionalEncoding2DRGBPallas:
    """Mirrors PositionalEncoding2D_RGB.__init__ / forward semantics."""

    def __init__(self, channels):
        self.org_channels = channels
        channels = int(np.ceil(channels / 4) * 2)
        self.channels = channels
        # Kept only for parity with the torch buffer / the reference below;
        # the kernel recomputes these frequencies on the fly.
        self.inv_freq = 1.0 / (
            10000.0 ** (jnp.arange(0, channels, 2, dtype=jnp.float32) / channels)
        )

    def __call__(self, tensor):
        return positional_encoding_2d_rgb(tensor, self.channels)


def _reference(tensor, inv_freq):
    # Pure-JAX mirror of the torch forward (f32 math, like the torch buffer).
    pos_x = tensor[:, :, 0].astype(jnp.float32)
    pos_y = tensor[:, :, 1].astype(jnp.float32)
    sin_inp_x = jnp.einsum('ki,j->kij', pos_x, inv_freq)
    sin_inp_y = jnp.einsum('ki,j->kij', pos_y, inv_freq)
    emb_x = jnp.concatenate([jnp.sin(sin_inp_x), jnp.cos(sin_inp_x)], axis=-1)
    emb_y = jnp.concatenate([jnp.sin(sin_inp_y), jnp.cos(sin_inp_y)], axis=-1)
    return jnp.concatenate([emb_x, emb_y], axis=-1).astype(tensor.dtype)


if __name__ == "__main__":
    key = jax.random.PRNGKey(0)
    k1, k2, k3 = jax.random.split(key, 3)

    # --- main check: shapes from the transformer use-case ------------------
    batch, person_num, feat = 2, 8, 3          # only x, y columns are used
    org_channels = 32                          # transformer hidden size

    module = PositionalEncoding2DRGBPallas(org_channels)
    x = jax.random.uniform(k1, (batch, person_num, feat), dtype=jnp.float32)

    out = module(x)
    out = jax.block_until_ready(out)
    assert out.shape == (batch, person_num, 2 * module.channels), out.shape
    ref = _reference(x, module.inv_freq)
    np.testing.assert_allclose(np.asarray(out), np.asarray(ref),
                               rtol=1e-5, atol=1e-5)

    # --- multi-tile / padding path (grid with several parallel steps) ------
    x2 = jax.random.uniform(k2, (3, 100, 3), dtype=jnp.float32)
    out2 = positional_encoding_2d_rgb(x2, module.channels, row_tile=128)
    out2 = jax.block_until_ready(out2)
    ref2 = _reference(x2, module.inv_freq)
    np.testing.assert_allclose(np.asarray(out2), np.asarray(ref2),
                               rtol=1e-5, atol=1e-5)

    # --- bf16 input: compute in f32 inside the kernel, cast on store -------
    x3 = jax.random.uniform(k3, (batch, person_num, feat),
                            dtype=jnp.float32).astype(jnp.bfloat16)
    out3 = jax.block_until_ready(module(x3))
    ref3 = _reference(x3, module.inv_freq)
    np.testing.assert_allclose(np.asarray(out3, dtype=np.float32),
                               np.asarray(ref3, dtype=np.float32),
                               rtol=2e-2, atol=2e-2)

    print("KERNEL_OK")
</pallas_src>

<mosaic_0001>
module attributes {stable_mosaic.version = 11 : i64} {
  func.func @_pe2d_rgb_kernel(%arg0: i32, %arg1: memref<2x128xf32, #tpu.memory_space<vmem>>, %arg2: memref<32x128xf32, #tpu.memory_space<vmem>>) attributes {dimension_semantics = [#tpu.dimension_semantics<parallel>], iteration_bounds = array<i64: 1>, scalar_prefetch = 0 : i64, scratch_operands = 0 : i64, tpu.core_type = #tpu.core_type<tc>, window_params = [{transform_indices = @transform_0, window_bounds = array<i64: 2, 128>}, {transform_indices = @transform_1, window_bounds = array<i64: 32, 128>}]} {
    %c0 = arith.constant 0 : index
    %c0_0 = arith.constant 0 : index
    %0 = vector.load %arg1[%c0, %c0_0] : memref<2x128xf32, #tpu.memory_space<vmem>>, vector<2x128xf32>
    %1 = vector.extract_strided_slice %0 {offsets = [0, 0], sizes = [1, 128], strides = [1, 1]} : vector<2x128xf32> to vector<1x128xf32>
    %2 = vector.extract_strided_slice %0 {offsets = [1, 0], sizes = [1, 128], strides = [1, 1]} : vector<2x128xf32> to vector<1x128xf32>
    %3 = tpu.iota {dimensions = array<i32: 0>} : vector<8x128xi32>
    %4 = arith.sitofp %3 : vector<8x128xi32> to vector<8x128xf32>
    %cst = arith.constant -1.15129256 : f32
    %5 = vector.broadcast %cst : f32 to vector<8x128xf32>
    %6 = arith.mulf %4, %5 : vector<8x128xf32>
    %7 = math.exp %6 : vector<8x128xf32>
    %8 = vector.broadcast %1 : vector<1x128xf32> to vector<8x128xf32>
    %9 = arith.mulf %7, %8 : vector<8x128xf32>
    %10 = vector.broadcast %2 : vector<1x128xf32> to vector<8x128xf32>
    %11 = arith.mulf %7, %10 : vector<8x128xf32>
    %12 = math.sin %9 : vector<8x128xf32>
    %13 = math.cos %9 : vector<8x128xf32>
    %14 = math.sin %11 : vector<8x128xf32>
    %15 = math.cos %11 : vector<8x128xf32>
    %16 = tpu.concatenate %12, %13, %14, %15 in 0 : vector<8x128xf32>, vector<8x128xf32>, vector<8x128xf32>, vector<8x128xf32> -> vector<32x128xf32>
    %c0_1 = arith.constant 0 : index
    %c0_2 = arith.constant 0 : index
    %17 = vector.load %arg2[%c0_1, %c0_2] : memref<32x128xf32, #tpu.memory_space<vmem>>, vector<32x128xf32>
    tpu.vector_store %arg2[%c0_1, %c0_2], %16 {strides = array<i32>} : memref<32x128xf32, #tpu.memory_space<vmem>>, vector<32x128xf32>,
    return
  }
  func.func @transform_0(%arg0: i32) -> (i32, i32) {
    %c0_i32 = arith.constant 0 : i32
    %c0_i32_0 = arith.constant 0 : i32
    return %c0_i32, %arg0 : i32, i32
  }
  func.func @transform_1(%arg0: i32) -> (i32, i32) {
    %c0_i32 = arith.constant 0 : i32
    %c0_i32_0 = arith.constant 0 : i32
    return %c0_i32, %arg0 : i32, i32
  }
}

</mosaic_0001>

<bundles_post_ra>
// kernel: tpu_custom_call.1
= control target key start
LH: loop header
LB: loop body
LE: loop exit
PB: predicated region body
PF: predicated region fallthrough
CT: control target
= control target key end

     0   :  { %6 = vsyncpa [#allocation3], 0  ;;  %s941_s0 = inlined_call_operand.hbm [shape: f32[2,128], index: 0, kind: input, shape index: {}]   ;;  %s942_s1 = inlined_call_operand.hbm [shape: f32[32,128], index: 1, kind: output, shape index: {}]  }
   0x1   :  { %7 = vsyncpa [#allocation4], 0  ;;  %s13_s8 = sshll.u32 %s941_s0, 4  ;;  %s752_s9 = smov [#allocation2]   ;;  %s14_s8 = int_to_ptr.hbm [resolvable:$true] %s13_s8 }
   0x2   :  { %s15_s10 = sshll.u32 %s752_s9, 4  ;;  %s16_s10 = int_to_ptr.vmem [resolvable:$true] %s15_s10 }
   0x3   :  { %18 = dma.hbm_to_vmem [thread:$0]  %s14_s8, 32, %s16_s10, [#allocation3]  }
   0x4   :  { %748 = dma.done.wait [#allocation3], 32  }
   0x5   :  { %749 = vsyncadd [#allocation3], 4294967264  ;;  %v24_v0 = vlaneseq  ;;  %v23_v5 = vld [vmem:[#allocation2] sm:$0x3]  ;;  %v753_v32 = vmov 683565275  }
   0x6   :  { %v30_v6 = vperm.slane %v23_v5, 0  ;;  %v32_v7 = vperm.slane %v23_v5, 1  ;;  %v754_v34 = vmov 2475754826   ;;  %v755_v36 = vmov 2131351028  }
   0x7   :  { %v25_v1 = vshrl.u32 %v24_v0, 7  ;;  %v756_v38 = vmov 2102212464   ;;  %v757_v40 = vmov 920167782   ;;  %s760_s0 = smov [#allocation5]  }
   0x8   :  { %v758_v49 = vmov 1326507024   ;;  %s660_s11 = sshll.u32 %s760_s0, 4  ;;  %s662_s14 = sshll.u32 %s942_s1, 4  ;;  %s661_s11 = int_to_ptr.vmem [resolvable:$true] %s660_s11  ;;  %s663_s14 = int_to_ptr.hbm [resolvable:$true] %s662_s14 }
   0x9   :  { %v26_v2 = vcvt.s32.f32 %v25_v1  ;;  %s761_s15 = smov 128   ;;  %s762_s16 = smov 8  }
   0xb   :  { %v27_v3 = vmul.f32 -1.1512926, %v26_v2 }
   0xd   :  { %v28_v4 = vmul.f32 1.442695, %v27_v3 }
   0xf   :  { %698 = vpow2.f32 %v28_v4 }
  0x15   :  { %v699_v8 = vpop.eup %698 }
  0x16   :  { %v776_v9 = vmul.f32 %v699_v8, %v30_v6  ;;  %v778_v10 = vmul.f32 %v699_v8, %v32_v7 }
  0x18   :  { %v34_v11 = vand.u32 2147483647, %v776_v9  ;;  %v37_v12 = vand.u32 2139095040, %v776_v9  ;;  %v343_v13 = vand.u32 2147483647, %v778_v10  ;;  %v346_v14 = vand.u32 2139095040, %v778_v10 }
  0x1a   :  { %v38_v15 = vshrl.u32 %v37_v12, 23  ;;  %v41_v16 = vand.u32 8388607, %v34_v11  ;;  %v347_v17 = vshrl.u32 %v346_v14, 23  ;;  %v350_v21 = vand.u32 8388607, %v343_v13 }
  0x1c   :  { %v675_v18 = vadd.s32 4294967169, %v38_v15  ;;  %v42_v19 = vor.u32 8388608, %v41_v16  ;;  %v681_v20 = vadd.s32 4294967169, %v347_v17  ;;  %v351_v26 = vor.u32 8388608, %v350_v21 }
  0x1e   :  { %v44_v22 = vadd.s32 1, %v675_v18  ;;  %v353_v23 = vadd.s32 1, %v681_v20  ;;  %v788_v25 = vshll.u32 %v42_v19, 8  ;;  %v798_v43 = vshll.u32 %v351_v26, 8 }
  0x20   :  { %vm45_vm0 = vcmp.gt.s32.totalorder %v44_v22, 0  ;;  %vm354_vm1 = vcmp.gt.s32.totalorder %v353_v23, 0  ;;  %v83_v42 = vand.u32 65535, %v788_v25  ;;  %v84_v47 = vshrl.u32 %v788_v25, 16 }
  0x21   :  { %v46_v24 = vsel %vm45_vm0, %v44_v22, 0  ;;  %v355_v28 = vsel %vm354_vm1, %v353_v23, 0 }
  0x22   :  { %v48_v27 = vand.u32 31, %v46_v24  ;;  %v790_v29 = vshrl.u32 %v46_v24, 5  ;;  %v792_v30 = vand.u32 31, %v355_v28  ;;  %v816_v60 = vshrl.u32 %v355_v28, 5 }
  0x24   :  { %v49_v31 = vsub.s32 32, %v48_v27  ;;  %v51_v33 = vshll.u32 %v753_v32, %v48_v27  ;;  %v54_v35 = vshll.u32 %v754_v34, %v48_v27  ;;  %v57_v37 = vshll.u32 %v755_v36, %v48_v27 }
  0x25   :  { %v60_v39 = vshll.u32 %v756_v38, %v48_v27  ;;  %v63_v41 = vshll.u32 %v757_v40, %v48_v27  ;;  %vm66_vm2 = vcmp.lt.s32.totalorder %v790_v29, 1  ;;  %vm69_vm3 = vcmp.lt.s32.totalorder %v790_v29, 4 }
  0x26   :  { %v52_v44 = vshrl.u32 %v754_v34, %v49_v31  ;;  %v55_v45 = vshrl.u32 %v755_v36, %v49_v31  ;;  %v58_v46 = vshrl.u32 %v756_v38, %v49_v31  ;;  %v61_v48 = vshrl.u32 %v757_v40, %v49_v31 }
  0x27   :  { %v64_v50 = vshrl.u32 %v758_v49, %v49_v31  ;;  %v807_v54 = vsub.s32 32, %v792_v30  ;;  %v50_v55 = vshrl.u32 %v753_v32, %v49_v31  ;;  %vm68_vm4 = vcmp.lt.s32.totalorder %v790_v29, 3 }
  0x28   :  { %v53_v51 = vor.u32 %v52_v44, %v51_v33  ;;  %v56_v52 = vor.u32 %v55_v45, %v54_v35  ;;  %v59_v53 = vor.u32 %v58_v46, %v57_v37  ;;  %v62_v56 = vor.u32 %v61_v48, %v60_v39 }
  0x29   :  { %v65_v57 = vor.u32 %v64_v50, %v63_v41  ;;  %vm67_vm5 = vcmp.lt.s32.totalorder %v790_v29, 2  ;;  %v360_v63 = vshll.u32 %v753_v32, %v792_v30  ;;  %v363_v0 = vshll.u32 %v754_v34, %v792_v30 }
  0x2a   :  { %v74_v58 = vsel %vm66_vm2, %v53_v51, %v56_v52  ;;  %v78_v59 = vsel %vm66_vm2, %v56_v52, %v59_v53  ;;  %v75_v61 = vsel %vm69_vm3, %v62_v56, 920167782  ;;  %v71_v1 = vsel %vm69_vm3, %v59_v53, 2102212464 }
  0x2b   :  { %v79_v62 = vsel %vm69_vm3, %v65_v57, 1326507024  ;;  %v76_v2 = vsel %vm68_vm4, %v59_v53, %v75_v61  ;;  %v361_v4 = vshrl.u32 %v754_v34, %v807_v54  ;;  %v70_v5 = vsel %vm66_vm2, %v50_v55, %v53_v51 }
  0x2c   :  { %v80_v3 = vsel %vm68_vm4, %v62_v56, %v79_v62  ;;  %v77_v6 = vsel %vm67_vm5, %v74_v58, %v76_v2  ;;  %v364_v8 = vshrl.u32 %v755_v36, %v807_v54  ;;  %v72_v17 = vsel %vm68_vm4, %v56_v52, %v71_v1 }
  0x2d   :  { %v81_v7 = vsel %vm67_vm5, %v78_v59, %v80_v3  ;;  %v107_v15 = vand.u32 65535, %v77_v6  ;;  %v108_v16 = vshrl.u32 %v77_v6, 16  ;;  %v841_v18 = vor.u32 %v361_v4, %v360_v63 }
  0x2e   :  { %v85_v12 = vand.u32 65535, %v81_v7  ;;  %v86_v14 = vshrl.u32 %v81_v7, 16  ;;  %v843_v19 = vor.u32 %v364_v8, %v363_v0  ;;  %v366_v20 = vshll.u32 %v755_v36, %v792_v30 }
  0x2f   :  { %v367_v24 = vshrl.u32 %v756_v38, %v807_v54  ;;  %v109_v27 = vmul.u32 %v107_v15, %v83_v42  ;;  %v110_v28 = vmul.u32 %v108_v16, %v83_v42  ;;  %v111_v31 = vmul.u32 %v107_v15, %v84_v47 }
  0x30   :  { %v87_v21 = vmul.u32 %v85_v12, %v83_v42  ;;  %v88_v22 = vmul.u32 %v86_v14, %v83_v42  ;;  %v89_v23 = vmul.u32 %v85_v12, %v84_v47  ;;  %v90_v26 = vmul.u32 %v86_v14, %v84_v47 }
  0x31   :  { %v112_v37 = vmul.u32 %v108_v16, %v84_v47  ;;  %v113_v41 = vshll.u32 %v110_v28, 16  ;;  %v114_v44 = vshrl.u32 %v110_v28, 16  ;;  %v115_v45 = vshll.u32 %v111_v31, 16 }
  0x32   :  { %v91_v33 = vshll.u32 %v88_v22, 16  ;;  %v92_v34 = vshrl.u32 %v88_v22, 16  ;;  %v93_v35 = vshll.u32 %v89_v23, 16  ;;  %v94_v39 = vshrl.u32 %v89_v23, 16 }
  0x33   :  { %v116_v46 = vshrl.u32 %v111_v31, 16  ;;  %v369_v48 = vshll.u32 %v756_v38, %v792_v30  ;;  %v759_v50 = vmov 0   ;;  %vm117_vm7 = vc.u32 %v109_v27, %v113_v41 }
  0x34   :  { %vm95_vm6 = vc.u32 %v87_v21, %v91_v33  ;;  %v97_v36 = vadd.s32 %v91_v33, %v87_v21  ;;  %v119_v42 = vadd.s32 %v113_v41, %v109_v27  ;;  %v370_v52 = vshrl.u32 %v757_v40, %v807_v54 }
  0x35   :  { %v96_v51 = vsel %vm95_vm6, 1, %v759_v50  ;;  %v118_v47 = vsel %vm117_vm7, 1, %v759_v50  ;;  %v372_v55 = vshll.u32 %v757_v40, %v792_v30  ;;  %v368_v38 = vor.u32 %v367_v24, %v366_v20 }
  0x36   :  { %v98_v53 = vadd.s32 %v96_v51, %v90_v26  ;;  %vm99_vm8 = vc.u32 %v97_v36, %v93_v35  ;;  %v120_v57 = vadd.s32 %v118_v47, %v112_v37  ;;  %vm121_vm9 = vc.u32 %v119_v42, %v115_v45 }
  0x37   :  { %v100_v56 = vsel %vm99_vm8, 1, %v759_v50  ;;  %v122_v59 = vsel %vm121_vm9, 1, %v759_v50  ;;  %v371_v61 = vor.u32 %v370_v52, %v369_v48  ;;  %v373_v62 = vshrl.u32 %v758_v49, %v807_v54 }
  0x38   :  { %v102_v58 = vadd.s32 %v100_v56, %v98_v53  ;;  %v860_v63 = vadd.s32 %v119_v42, %v115_v45  ;;  %v124_v0 = vadd.s32 %v122_v59, %v120_v57  ;;  %vm375_vm10 = vcmp.lt.s32.totalorder %v816_v60, 1 }
  0x39   :  { %vm377_vm11 = vcmp.lt.s32.totalorder %v816_v60, 3  ;;  %v374_v40 = vor.u32 %v373_v62, %v372_v55  ;;  %vm376_vm12 = vcmp.lt.s32.totalorder %v816_v60, 2  ;;  %vm378_vm13 = vcmp.lt.s32.totalorder %v816_v60, 4 }
  0x3a   :  { %v103_v30 = vadd.s32 %v102_v58, %v92_v34  ;;  %v73_v1 = vsel %vm67_vm5, %v70_v5, %v72_v17  ;;  %v125_v2 = vadd.s32 %v124_v0, %v114_v44  ;;  %v383_v49 = vsel %vm375_vm10, %v841_v18, %v843_v19 }
  0x3b   :  { %v384_v3 = vsel %vm378_vm13, %v371_v61, 920167782  ;;  %v387_v7 = vsel %vm375_vm10, %v843_v19, %v368_v38  ;;  %v392_v29 = vand.u32 65535, %v798_v43  ;;  %v388_v12 = vsel %vm378_vm13, %v374_v40, 1326507024 }
  0x3c   :  { %v874_v4 = vadd.s32 %v103_v30, %v94_v39  ;;  %v385_v6 = vsel %vm377_vm11, %v368_v38, %v384_v3  ;;  %v126_v5 = vadd.s32 %v125_v2, %v116_v46  ;;  %v393_v14 = vshrl.u32 %v798_v43, 16 }
  0x3d   :  { %v386_v8 = vsel %vm376_vm12, %v383_v49, %v385_v6  ;;  %v127_v15 = vmul.u32 %v788_v25, %v73_v1  ;;  %v389_v16 = vsel %vm377_vm11, %v371_v61, %v388_v12  ;;  %v359_v23 = vshrl.u32 %v753_v32, %v807_v54 }
  0x3e   :  { %vm129_vm14 = vc.u32 %v874_v4, %v860_v63  ;;  %v416_v17 = vand.u32 65535, %v386_v8  ;;  %v130_v20 = vadd.s32 1, %v126_v5  ;;  %v390_v21 = vsel %vm376_vm12, %v387_v7, %v389_v16 }
  0x3f   :  { %v417_v22 = vshrl.u32 %v386_v8, 16  ;;  %v394_v24 = vand.u32 65535, %v390_v21  ;;  %v395_v26 = vshrl.u32 %v390_v21, 16  ;;  %v380_v44 = vsel %vm378_vm13, %v368_v38, 2102212464 }
  0x40   :  { %v131_v27 = vsel %vm129_vm14, %v130_v20, %v126_v5  ;;  %v418_v28 = vmul.u32 %v416_v17, %v392_v29  ;;  %v420_v31 = vmul.u32 %v416_v17, %v393_v14  ;;  %v379_v32 = vsel %vm375_vm10, %v359_v23, %v841_v18 }
  0x41   :  { %v419_v25 = vmul.u32 %v417_v22, %v392_v29  ;;  %v132_v33 = vadd.s32 %v131_v27, %v127_v15  ;;  %v396_v34 = vmul.u32 %v394_v24, %v392_v29  ;;  %v397_v35 = vmul.u32 %v395_v26, %v392_v29 }
  0x42   :  { %v398_v37 = vmul.u32 %v394_v24, %v393_v14  ;;  %v399_v45 = vmul.u32 %v395_v26, %v393_v14  ;;  %v421_v46 = vmul.u32 %v417_v22, %v393_v14  ;;  %v424_v48 = vshll.u32 %v420_v31, 16 }
  0x43   :  { %v422_v39 = vshll.u32 %v419_v25, 16  ;;  %v133_v41 = vadd.s32 536870912, %v132_v33  ;;  %v400_v36 = vshll.u32 %v397_v35, 16  ;;  %v381_v52 = vsel %vm377_vm11, %v843_v19, %v380_v44 }
  0x44   :  { %v402_v54 = vshll.u32 %v398_v37, 16  ;;  %v401_v18 = vshrl.u32 %v397_v35, 16  ;;  %v423_v58 = vshrl.u32 %v419_v25, 16  ;;  %v403_v62 = vshrl.u32 %v398_v37, 16 }
  0x45   :  { %v901_v51 = vshrl.u32 %v133_v41, 30  ;;  %vm404_vm15 = vc.u32 %v396_v34, %v400_v36  ;;  %v406_v42 = vadd.s32 %v400_v36, %v396_v34  ;;  %vm426_vm0 = vc.u32 %v418_v28, %v422_v39 }
  0x46   :  { %v405_v53 = vsel %vm404_vm15, 1, %v759_v50  ;;  %v427_v47 = vsel %vm426_vm0, 1, %v759_v50  ;;  %v428_v55 = vadd.s32 %v422_v39, %v418_v28  ;;  %v425_v30 = vshrl.u32 %v420_v31, 16 }
  0x47   :  { %v135_v56 = vshll.u32 %v901_v51, 30  ;;  %v407_v57 = vadd.s32 %v405_v53, %v399_v45  ;;  %vm408_vm1 = vc.u32 %v406_v42, %v402_v54  ;;  %v429_v59 = vadd.s32 %v427_v47, %v421_v46 }
  0x48   :  { %v409_v38 = vsel %vm408_vm1, 1, %v759_v50  ;;  %vm430_vm2 = vc.u32 %v428_v55, %v424_v48  ;;  %v432_v49 = vadd.s32 %v428_v55, %v424_v48  ;;  %v382_v3 = vsel %vm376_vm12, %v379_v32, %v381_v52 }
  0x49   :  { %v136_v61 = vsub.s32 %v132_v33, %v135_v56  ;;  %v411_v0 = vadd.s32 %v409_v38, %v407_v57  ;;  %v431_v19 = vsel %vm430_vm2, 1, %v759_v50  ;;  %v436_v12 = vmul.u32 %v798_v43, %v382_v3 }
  0x4a   :  { %v433_v40 = vadd.s32 %v431_v19, %v429_v59  ;;  %v128_v50 = vadd.s32 %v860_v63, %v874_v4  ;;  %v158_v35 = vsub.s32 4, %v901_v51  ;;  %vm36_vm6 = vcmp.lt.s32.totalorder %v776_v9, 0 }
  0x4b   :  { %vm137_vm3 = vcmp.lt.s32.totalorder %v136_v61, 0  ;;  %v138_v1 = vsub.s32 0, %v136_v61  ;;  %v412_v2 = vadd.s32 %v411_v0, %v401_v18  ;;  %vm35_vm8 = vcmp.le.f32.partialorder %v34_v11, 0.7853982 }
  0x4c   :  { %v434_v6 = vadd.s32 %v433_v40, %v423_v58  ;;  %v159_v45 = vsel %vm36_vm6, %v158_v35, %v901_v51  ;;  %vm345_vm13 = vcmp.lt.s32.totalorder %v778_v10, 0  ;;  %vm177_vm1 = vweird.f32 %v776_v9 }
  0x4d   :  { %v139_v7 = vsel %vm137_vm3, %v138_v1, %v136_v61  ;;  %v413_v29 = vadd.s32 %v412_v2, %v403_v62  ;;  %v161_v48 = vsel %vm35_vm8, 0, %v159_v45  ;;  %vm344_vm2 = vcmp.le.f32.partialorder %v343_v13, 0.7853982 }
  0x4e   :  { %v140_v5 = vclz %v139_v7  ;;  %v435_v8 = vadd.s32 %v434_v6, %v425_v30  ;;  %v178_v57 = vadd.s32 3, %v161_v48  ;;  %v333_v40 = vand.u32 3, %v161_v48 }
  0x4f   :  { %vm438_vm4 = vc.u32 %v413_v29, %v432_v49  ;;  %v437_v53 = vadd.s32 %v432_v49, %v413_v29 }
  0x50   :  { %v676_v14 = vadd.s32 4294967294, %v140_v5  ;;  %v439_v15 = vadd.s32 1, %v435_v8  ;;  %v179_v30 = vand.u32 3, %v178_v57  ;;  %vm338_vm11 = vcmp.eq.s32.totalorder %v333_v40, 2 }
  0x51   :  { %vm334_vm15 = vcmp.lt.s32.totalorder %v333_v40, 2  ;;  %vm335_vm0 = vcmp.eq.s32.totalorder %v333_v40, 0 }
  0x52   :  { %vm677_vm5 = vcmp.lt.s32.totalorder %v676_v14, 0  ;;  %v440_v16 = vsel %vm438_vm4, %v439_v15, %v435_v8  ;;  %vm184_vm10 = vcmp.eq.s32.totalorder %v179_v30, 2  ;;  %vm180_vm12 = vcmp.lt.s32.totalorder %v179_v30, 2 }
  0x53   :  { %v143_v17 = vsel %vm677_vm5, 0, %v676_v14  ;;  %v441_v20 = vadd.s32 %v440_v16, %v436_v12  ;;  %vm181_vm14 = vcmp.eq.s32.totalorder %v179_v30, 0 }
  0x54   :  { %v144_v21 = vsub.s32 32, %v143_v17  ;;  %v145_v60 = vshll.u32 %v136_v61, %v143_v17  ;;  %v148_v22 = vsub.s32 4294967266, %v143_v17 }
  0x55   :  { %v442_v26 = vadd.s32 536870912, %v441_v20 }
  0x56   :  { %v146_v23 = vshrl.u32 %v128_v50, %v144_v21  ;;  %v149_v24 = vadd.s32 127, %v148_v22 }
  0x57   :  { %v916_v25 = vshrl.u32 %v442_v26, 30 }
  0x58   :  { %v147_v27 = vor.u32 %v146_v23, %v145_v60  ;;  %v150_v28 = vshll.u32 %v149_v24, 23 }
  0x59   :  { %v444_v33 = vshll.u32 %v916_v25, 30  ;;  %v467_v17 = vsub.s32 4, %v916_v25 }
  0x5a   :  { %v151_v43 = vor.u32 4788187, %v150_v28  ;;  %v154_v31 = vcvt.s32.f32 %v147_v27 }
  0x5b   :  { %v445_v63 = vsub.s32 %v441_v20, %v444_v33  ;;  %v468_v28 = vsel %vm345_vm13, %v467_v17, %v916_v25 }
  0x5c   :  { %v152_v34 = vand.u32 2147483647, %v151_v43  ;;  %v470_v13 = vsel %vm344_vm2, 0, %v468_v28 }
  0x5d   :  { %vm446_vm7 = vcmp.lt.s32.totalorder %v445_v63, 0  ;;  %v447_v37 = vsub.s32 0, %v445_v63  ;;  %v642_v45 = vand.u32 3, %v470_v13 }
  0x5e   :  { %v155_v4 = vmul.f32 %v154_v31, %v152_v34 }
  0x5f   :  { %v448_v41 = vsel %vm446_vm7, %v447_v37, %v445_v63  ;;  %vm647_vm4 = vcmp.eq.s32.totalorder %v642_v45, 2  ;;  %vm644_vm7 = vcmp.eq.s32.totalorder %v642_v45, 0 }
  0x60   :  { %v156_v39 = vxor.u32 2147483648, %v155_v4  ;;  %v449_v36 = vclz %v448_v41 }
  0x62   :  { %v157_v44 = vsel %vm36_vm6, %v156_v39, %v155_v4  ;;  %v682_v46 = vadd.s32 4294967294, %v449_v36  ;;  %v487_v4 = vadd.s32 3, %v470_v13 }
  0x63   :  { %v160_v32 = vsel %vm35_vm8, %v776_v9, %v157_v44  ;;  %vm643_vm8 = vcmp.lt.s32.totalorder %v642_v45, 2 }
  0x64   :  { %v162_v54 = vmul.f32 %v160_v32, %v160_v32  ;;  %vm683_vm9 = vcmp.lt.s32.totalorder %v682_v46, 0  ;;  %v488_v44 = vand.u32 3, %v487_v4 }
  0x65   :  { %v452_v47 = vsel %vm683_vm9, 0, %v682_v46  ;;  %vm486_vm9 = vweird.f32 %v778_v10 }
  0x66   :  { %v163_v42 = vmul.f32 -0.001358992, %v162_v54  ;;  %v170_v52 = vmul.f32 -0.00019511016, %v162_v54  ;;  %v453_v18 = vsub.s32 32, %v452_v47  ;;  %v454_v11 = vshll.u32 %v445_v63, %v452_v47 }
  0x67   :  { %v457_v38 = vsub.s32 4294967266, %v452_v47  ;;  %vm493_vm3 = vcmp.eq.s32.totalorder %v488_v44, 2  ;;  %vm489_vm5 = vcmp.lt.s32.totalorder %v488_v44, 2  ;;  %vm490_vm6 = vcmp.eq.s32.totalorder %v488_v44, 0 }
  0x68   :  { %v164_v55 = vadd.f32 0.041655596, %v163_v42  ;;  %v171_v56 = vadd.f32 0.008332121, %v170_v52  ;;  %v455_v51 = vshrl.u32 %v437_v53, %v453_v18 }
  0x69   :  { %v458_v61 = vadd.s32 127, %v457_v38 }
  0x6a   :  { %v165_v58 = vmul.f32 %v164_v55, %v162_v54  ;;  %v172_v59 = vmul.f32 %v171_v56, %v162_v54  ;;  %v456_v19 = vor.u32 %v455_v51, %v454_v11 }
  0x6b   :  { %v459_v1 = vshll.u32 %v458_v61, 23 }
  0x6c   :  { %v166_v62 = vadd.f32 -0.4999988, %v165_v58  ;;  %v173_v0 = vadd.f32 -0.16666654, %v172_v59  ;;  %v463_v6 = vcvt.s32.f32 %v456_v19 }
  0x6d   :  { %v460_v3 = vor.u32 4788187, %v459_v1 }
  0x6e   :  { %v167_v2 = vmul.f32 %v166_v62, %v162_v54  ;;  %v174_v49 = vmul.f32 %v173_v0, %v162_v54 }
  0x6f   :  { %v461_v5 = vand.u32 2147483647, %v460_v3 }
  0x70   :  { %v168_v7 = vadd.f32 1.0, %v167_v2  ;;  %v175_v29 = vadd.f32 1.0, %v174_v49 }
  0x71   :  { %v464_v14 = vmul.f32 %v463_v6, %v461_v5 }
  0x72   :  { %v176_v8 = vmul.f32 %v175_v29, %v160_v32  ;;  %v185_v12 = vxor.u32 2147483648, %v168_v7 }
  0x73   :  { %v465_v20 = vxor.u32 2147483648, %v464_v14 }
  0x74   :  { %v182_v15 = vxor.u32 2147483648, %v176_v8  ;;  %v186_v50 = vsel %vm184_vm10, %v185_v12, %v176_v8  ;;  %v340_v16 = vsel %vm338_vm11, %v185_v12, %v176_v8 }
  0x75   :  { %v466_v24 = vsel %vm345_vm13, %v465_v20, %v464_v14 }
  0x76   :  { %v183_v21 = vsel %vm181_vm14, %v168_v7, %v182_v15  ;;  %v337_v60 = vsel %vm335_vm0, %v168_v7, %v182_v15  ;;  %v469_v9 = vsel %vm344_vm2, %v778_v10, %v466_v24 }
  0x77   :  { %v187_v22 = vsel %vm180_vm12, %v183_v21, %v186_v50  ;;  %v341_v23 = vsel %vm334_vm15, %v337_v60, %v340_v16  ;;  %v471_v43 = vmul.f32 %v469_v9, %v469_v9 }
  0x78   :  { %v188_v26 = vsel %vm177_vm1, nan, %v187_v22  ;;  %v342_v27 = vsel %vm177_vm1, nan, %v341_v23 }
  0x79   :  { %652 = vst [vmem:[#allocation5] sm:$0xff] %v188_v26  ;;  %v472_v31 = vmul.f32 -0.001358992, %v471_v43  ;;  %v479_v33 = vmul.f32 -0.00019511016, %v471_v43 }
  0x7a   :  { %653 = vst [vmem:[#allocation5 + $0x8] sm:$0xff] %v342_v27 }
  0x7b   :  { %v473_v34 = vadd.f32 0.041655596, %v472_v31  ;;  %v480_v63 = vadd.f32 0.008332121, %v479_v33 }
  0x7d   :  { %v474_v35 = vmul.f32 %v473_v34, %v471_v43  ;;  %v481_v37 = vmul.f32 %v480_v63, %v471_v43 }
  0x7f   :  { %v475_v39 = vadd.f32 -0.4999988, %v474_v35  ;;  %v482_v41 = vadd.f32 -0.16666654, %v481_v37 }
  0x81   :  { %v476_v36 = vmul.f32 %v475_v39, %v471_v43  ;;  %v483_v32 = vmul.f32 %v482_v41, %v471_v43 }
  0x83   :  { %v477_v25 = vadd.f32 1.0, %v476_v36  ;;  %v484_v54 = vadd.f32 1.0, %v483_v32 }
  0x85   :  { %v485_v46 = vmul.f32 %v484_v54, %v469_v9  ;;  %v494_v48 = vxor.u32 2147483648, %v477_v25 }
  0x87   :  { %v491_v42 = vxor.u32 2147483648, %v485_v46  ;;  %v495_v52 = vsel %vm493_vm3, %v494_v48, %v485_v46  ;;  %v649_v53 = vsel %vm647_vm4, %v494_v48, %v485_v46 }
  0x89   :  { %v492_v47 = vsel %vm490_vm6, %v477_v25, %v491_v42  ;;  %v646_v55 = vsel %vm644_vm7, %v477_v25, %v491_v42 }
  0x8a   :  { %v496_v56 = vsel %vm489_vm5, %v492_v47, %v495_v52  ;;  %v650_v18 = vsel %vm643_vm8, %v646_v55, %v649_v53 }
  0x8b   :  { %v497_v11 = vsel %vm486_vm9, nan, %v496_v56  ;;  %v651_v57 = vsel %vm486_vm9, nan, %v650_v18 }
  0x8c   :  { %654 = vst [vmem:[#allocation5 + $0x10] sm:$0xff] %v497_v11 }
  0x8d   :  { %655 = vst [vmem:[#allocation5 + $0x18] sm:$0xff] %v651_v57 }
  0x8e   :  { %668 = dma.vmem_to_hbm [thread:$0]  %s661_s11, 512, %s663_s14, [#allocation4], %s761_s15, %s761_s15, %s762_s16  }
  0x8f   :  { %750 = dma.done.wait [#allocation4], 512  }
  0x90   :  { %751 = vsyncadd [#allocation4], 4294966784 }
  0x91   :  { %673 = vsyncpa [#allocation3], 1 }
  0x92   :  { %674 = vsyncpa [#allocation4], 1 }

</bundles_post_ra>
